<compile_context>
chip_gen: v5e
topology: v5e:2x2
jax: 0.10.0
libtpu: 0.0.40
codegen_flags: <defaults>
</compile_context>

<pallas_src>
import functools
import math

import jax
import jax.numpy as jnp
from jax import lax
from jax.experimental import pallas as pl
from jax.experimental.pallas import tpu as pltpu

LANE = 128      # TPU lane width; also the fused-head output slab width
SUBLANE = 8     # f32 sublane tile
NEG_BIG = -1e30  # finite "minus infinity" for masked softmax lanes


def _round_up(x, m):
    return ((x + m - 1) // m) * m


def _ac_kernel(num_actions, s_ref, w1_ref, b1_ref, wh_ref, bh_ref, out_ref):
    x = s_ref[...]                                                   # [TB, S]

    # fc1 + ReLU (f32 accumulation on the MXU).
    h = jnp.dot(x, w1_ref[...], preferred_element_type=jnp.float32)
    h = jnp.maximum(h + b1_ref[...], 0.0)                            # [TB, H]

    # Fused heads: a single lane-dense matmul.
    #   lane 0           -> value head
    #   lanes 1..A       -> action logits
    #   lanes A+1..127   -> zero padding (masked out of the softmax)
    z = jnp.dot(h, wh_ref[...], preferred_element_type=jnp.float32)
    z = z + bh_ref[...]                                              # [TB, 128]

    col = lax.broadcasted_iota(jnp.int32, z.shape, dimension=1)
    is_action = jnp.logical_and(col >= 1, col <= num_actions)

    # Numerically stable softmax restricted to the action lanes.
    logits = jnp.where(is_action, z, NEG_BIG)
    m = jnp.max(logits, axis=-1, keepdims=True)
    e = jnp.exp(logits - m)                  # underflows to 0 off-action
    denom = jnp.sum(e, axis=-1, keepdims=True)
    probs = e / denom                        # exact divide (correctness first)

    # One full-width, lane-dense store: value in lane 0, probs in lanes 1..A.
    out_ref[...] = jnp.where(col == 0, z, probs)


def ac_forward(state, params):
    """state: [B, state_size] float32. Returns (state_value [B,1], action_probs [B,A])."""
    B, S = state.shape
    A = params["num_actions"]
    H = params["w1"].shape[1]

    # Pad batch to fill the f32 sublane tile; tile it if it is large so the
    # batch grid axis can be sharded across TensorCores (v7x megacore).
    if B <= LANE:
        tb = max(SUBLANE, _round_up(B, SUBLANE))
    else:
        tb = LANE
    b_pad = _round_up(B, tb)
    if b_pad != B:
        state = jnp.pad(state, ((0, b_pad - B), (0, 0)))

    grid = (b_pad // tb,)
    kernel = functools.partial(_ac_kernel, A)

    out = pl.pallas_call(
        kernel,
        out_shape=jax.ShapeDtypeStruct((b_pad, LANE), jnp.float32),
        grid=grid,
        in_specs=[
            pl.BlockSpec((tb, S), lambda i: (i, 0)),        # state tile
            pl.BlockSpec((S, H), lambda i: (0, 0)),         # W1 (VMEM-resident)
            pl.BlockSpec((1, H), lambda i: (0, 0)),         # b1
            pl.BlockSpec((H, LANE), lambda i: (0, 0)),      # fused head weights
            pl.BlockSpec((1, LANE), lambda i: (0, 0)),      # fused head biases
        ],
        out_specs=pl.BlockSpec((tb, LANE), lambda i: (i, 0)),
        compiler_params=pltpu.CompilerParams(
            dimension_semantics=("parallel",)),
    )(state, params["w1"], params["b1"], params["wh"], params["bh"])

    state_value = out[:B, 0:1]
    action_probs = out[:B, 1:1 + A]
    return state_value, action_probs


def init_params(key, state_size, action_size, fc1_units=128):
    """Deterministic init mimicking torch.nn.Linear defaults:
    U(-1/sqrt(fan_in), 1/sqrt(fan_in)) for weights and biases.
    Weights stored transposed vs PyTorch, i.e. [in, out]."""
    assert action_size + 1 <= LANE, "fused head assumes A + 1 <= 128"
    ks = jax.random.split(key, 6)

    def linear(kw, kb, fan_in, fan_out):
        bound = 1.0 / math.sqrt(fan_in)
        w = jax.random.uniform(kw, (fan_in, fan_out), jnp.float32, -bound, bound)
        b = jax.random.uniform(kb, (1, fan_out), jnp.float32, -bound, bound)
        return w, b

    w1, b1 = linear(ks[0], ks[1], state_size, fc1_units)
    wa, ba = linear(ks[2], ks[3], fc1_units, action_size)
    wv, bv = linear(ks[4], ks[5], fc1_units, 1)

    # Fused, lane-padded head: column 0 = value, columns 1..A = actions.
    wh = jnp.zeros((fc1_units, LANE), jnp.float32)
    wh = wh.at[:, 0:1].set(wv).at[:, 1:1 + action_size].set(wa)
    bh = jnp.zeros((1, LANE), jnp.float32)
    bh = bh.at[:, 0:1].set(bv).at[:, 1:1 + action_size].set(ba)
    # NOTE: for v6e/v7x, casting w1/wh (and h) to bfloat16 while keeping
    # preferred_element_type=jnp.float32 halves weight DMA bytes.  Kept f32
    # here so the reference check is tight and v5e gets no extra casts.

    return {"w1": w1, "b1": b1, "wa": wa, "ba": ba, "wv": wv, "bv": bv,
            "wh": wh, "bh": bh, "num_actions": action_size}


if __name__ == "__main__":
    # LunarLander-like sizes: state_size=8, action_size=4, fc1_units=128.
    B, STATE, ACTIONS, HIDDEN = 2, 8, 4, 128

    key = jax.random.PRNGKey(0)
    k_params, k_state = jax.random.split(key)
    params = init_params(k_params, STATE, ACTIONS, HIDDEN)
    state = jax.random.normal(k_state, (B, STATE), jnp.float32)

    state_value, action_probs = ac_forward(state, params)
    jax.block_until_ready((state_value, action_probs))

    # Reference in plain JAX (same math, exact divide).
    h_ref = jnp.maximum(state @ params["w1"] + params["b1"], 0.0)
    v_ref = h_ref @ params["wv"] + params["bv"]
    p_ref = jax.nn.softmax(h_ref @ params["wa"] + params["ba"], axis=-1)

    assert state_value.shape == (B, 1) and action_probs.shape == (B, ACTIONS)
    assert jnp.allclose(state_value, v_ref, atol=1e-5)
    assert jnp.allclose(action_probs, p_ref, atol=1e-4)
    assert jnp.allclose(jnp.sum(action_probs, axis=-1), 1.0, atol=1e-4)

    print("KERNEL_OK")
</pallas_src>

<mosaic_0001>
module attributes {stable_mosaic.version = 11 : i64} {
  func.func @_ac_kernel(%arg0: i32, %arg1: memref<8x8xf32, #tpu.memory_space<vmem>>, %arg2: memref<8x128xf32, #tpu.memory_space<vmem>>, %arg3: memref<1x128xf32, #tpu.memory_space<vmem>>, %arg4: memref<128x128xf32, #tpu.memory_space<vmem>>, %arg5: memref<1x128xf32, #tpu.memory_space<vmem>>, %arg6: memref<8x128xf32, #tpu.memory_space<vmem>>) attributes {dimension_semantics = [#tpu.dimension_semantics<parallel>], iteration_bounds = array<i64: 1>, scalar_prefetch = 0 : i64, scratch_operands = 0 : i64, tpu.core_type = #tpu.core_type<tc>, window_params = [{transform_indices = @transform_0, window_bounds = array<i64: 8, 8>}, {pipeline_mode = #tpu.pipeline_mode<synchronous>, transform_indices = @transform_1, window_bounds = array<i64: 8, 128>}, {pipeline_mode = #tpu.pipeline_mode<synchronous>, transform_indices = @transform_2, window_bounds = array<i64: 1, 128>}, {pipeline_mode = #tpu.pipeline_mode<synchronous>, transform_indices = @transform_3, window_bounds = array<i64: 128, 128>}, {pipeline_mode = #tpu.pipeline_mode<synchronous>, transform_indices = @transform_4, window_bounds = array<i64: 1, 128>}, {transform_indices = @transform_5, window_bounds = array<i64: 8, 128>}]} {
    %c0 = arith.constant 0 : index
    %c0_0 = arith.constant 0 : index
    %0 = vector.load %arg1[%c0, %c0_0] : memref<8x8xf32, #tpu.memory_space<vmem>>, vector<8x8xf32>
    %c0_1 = arith.constant 0 : index
    %c0_2 = arith.constant 0 : index
    %1 = vector.load %arg2[%c0_1, %c0_2] : memref<8x128xf32, #tpu.memory_space<vmem>>, vector<8x128xf32>
    %cst = arith.constant dense<0.000000e+00> : vector<8x128xf32>
    %2 = tpu.matmul %0, %1, %cst {dimension_numbers = #tpu.dot_dimension_numbers<[1], [0], [0], [1], [0, 0, 1, 1], [], []>} : vector<8x8xf32>, vector<8x128xf32>, vector<8x128xf32> -> vector<8x128xf32>
    %c0_3 = arith.constant 0 : index
    %c0_4 = arith.constant 0 : index
    %3 = vector.load %arg3[%c0_3, %c0_4] : memref<1x128xf32, #tpu.memory_space<vmem>>, vector<1x128xf32>
    %4 = vector.broadcast %3 : vector<1x128xf32> to vector<8x128xf32>
    %5 = arith.addf %2, %4 : vector<8x128xf32>
    %cst_5 = arith.constant 0.000000e+00 : f32
    %6 = vector.broadcast %cst_5 : f32 to vector<8x128xf32>
    %7 = arith.maximumf %5, %6 : vector<8x128xf32>
    %c0_6 = arith.constant 0 : index
    %c0_7 = arith.constant 0 : index
    %8 = vector.load %arg4[%c0_6, %c0_7] : memref<128x128xf32, #tpu.memory_space<vmem>>, vector<128x128xf32>
    %cst_8 = arith.constant dense<0.000000e+00> : vector<8x128xf32>
    %9 = tpu.matmul %7, %8, %cst_8 {dimension_numbers = #tpu.dot_dimension_numbers<[1], [0], [0], [1], [0, 0, 1, 1], [], []>} : vector<8x128xf32>, vector<128x128xf32>, vector<8x128xf32> -> vector<8x128xf32>
    %c0_9 = arith.constant 0 : index
    %c0_10 = arith.constant 0 : index
    %10 = vector.load %arg5[%c0_9, %c0_10] : memref<1x128xf32, #tpu.memory_space<vmem>>, vector<1x128xf32>
    %11 = vector.broadcast %10 : vector<1x128xf32> to vector<8x128xf32>
    %12 = arith.addf %9, %11 : vector<8x128xf32>
    %13 = tpu.iota {dimensions = array<i32: 1>} : vector<8x128xi32>
    %c1_i32 = arith.constant 1 : i32
    %14 = vector.broadcast %c1_i32 : i32 to vector<8x128xi32>
    %15 = arith.cmpi sge, %13, %14 : vector<8x128xi32>
    %c4_i32 = arith.constant 4 : i32
    %16 = vector.broadcast %c4_i32 : i32 to vector<8x128xi32>
    %17 = arith.cmpi sle, %13, %16 : vector<8x128xi32>
    %18 = arith.andi %15, %17 : vector<8x128xi1>
    %cst_11 = arith.constant -1.000000e+30 : f32
    %19 = vector.broadcast %cst_11 : f32 to vector<8x128xf32>
    %20 = arith.select %18, %12, %19 : vector<8x128xi1>, vector<8x128xf32>
    %cst_12 = arith.constant dense<0xFF800000> : vector<8xf32>
    %21 = vector.multi_reduction <maximumf>, %20, %cst_12 [1] : vector<8x128xf32> to vector<8xf32>
    %22 = vector.shape_cast %21 : vector<8xf32> to vector<8x1xf32>
    %23 = vector.broadcast %22 : vector<8x1xf32> to vector<8x128xf32>
    %24 = arith.subf %20, %23 : vector<8x128xf32>
    %25 = math.exp %24 : vector<8x128xf32>
    %cst_13 = arith.constant dense<0.000000e+00> : vector<8xf32>
    %26 = vector.multi_reduction <add>, %25, %cst_13 [1] : vector<8x128xf32> to vector<8xf32>
    %27 = vector.shape_cast %26 : vector<8xf32> to vector<8x1xf32>
    %28 = vector.broadcast %27 : vector<8x1xf32> to vector<8x128xf32>
    %29 = arith.divf %25, %28 : vector<8x128xf32>
    %c0_i32 = arith.constant 0 : i32
    %30 = vector.broadcast %c0_i32 : i32 to vector<8x128xi32>
    %31 = arith.cmpi eq, %13, %30 : vector<8x128xi32>
    %32 = arith.select %31, %12, %29 : vector<8x128xi1>, vector<8x128xf32>
    %c0_14 = arith.constant 0 : index
    %c0_15 = arith.constant 0 : index
    %33 = vector.load %arg6[%c0_14, %c0_15] : memref<8x128xf32, #tpu.memory_space<vmem>>, vector<8x128xf32>
    tpu.vector_store %arg6[%c0_14, %c0_15], %32 {strides = array<i32>} : memref<8x128xf32, #tpu.memory_space<vmem>>, vector<8x128xf32>,
    return
  }
  func.func @transform_0(%arg0: i32) -> (i32, i32) {
    %c0_i32 = arith.constant 0 : i32
    %c0_i32_0 = arith.constant 0 : i32
    return %arg0, %c0_i32 : i32, i32
  }
  func.func @transform_1(%arg0: i32) -> (i32, i32) {
    %c0_i32 = arith.constant 0 : i32
    %c0_i32_0 = arith.constant 0 : i32
    %c0_i32_1 = arith.constant 0 : i32
    return %c0_i32, %c0_i32_0 : i32, i32
  }
  func.func @transform_2(%arg0: i32) -> (i32, i32) {
    %c0_i32 = arith.constant 0 : i32
    %c0_i32_0 = arith.constant 0 : i32
    %c0_i32_1 = arith.constant 0 : i32
    return %c0_i32, %c0_i32_0 : i32, i32
  }
  func.func @transform_3(%arg0: i32) -> (i32, i32) {
    %c0_i32 = arith.constant 0 : i32
    %c0_i32_0 = arith.constant 0 : i32
    %c0_i32_1 = arith.constant 0 : i32
    return %c0_i32, %c0_i32_0 : i32, i32
  }
  func.func @transform_4(%arg0: i32) -> (i32, i32) {
    %c0_i32 = arith.constant 0 : i32
    %c0_i32_0 = arith.constant 0 : i32
    %c0_i32_1 = arith.constant 0 : i32
    return %c0_i32, %c0_i32_0 : i32, i32
  }
  func.func @transform_5(%arg0: i32) -> (i32, i32) {
    %c0_i32 = arith.constant 0 : i32
    %c0_i32_0 = arith.constant 0 : i32
    return %arg0, %c0_i32 : i32, i32
  }
}

</mosaic_0001>

<bundles_post_ra>
// kernel: tpu_custom_call.1
= control target key start
LH: loop header
LB: loop body
LE: loop exit
PB: predicated region body
PF: predicated region fallthrough
CT: control target
= control target key end

     0   :  { %10 = vsyncpa [#allocation3], 0  ;;  %s353_s0 = inlined_call_operand.hbm [shape: f32[8,8], index: 0, kind: input, shape index: {}]   ;;  %s354_s1 = inlined_call_operand.hbm [shape: f32[8,128], index: 1, kind: input, shape index: {}]   ;;  %s355_s2 = inlined_call_operand.vmem [shape: f32[1,128], index: 2, kind: input, shape index: {}]   ;;  %s356_s3 = inlined_call_operand.hbm [shape: f32[128,128], index: 3, kind: input, shape index: {}]   ;;  %s357_s4 = inlined_call_operand.vmem [shape: f32[1,128], index: 4, kind: input, shape index: {}]   ;;  %s358_s5 = inlined_call_operand.hbm [shape: f32[8,128], index: 5, kind: output, shape index: {}]  }
   0x1   :  { %11 = vsyncpa [#allocation6], 0  ;;  %s29_s20 = sshll.u32 %s354_s1, 4  ;;  %s30_s20 = int_to_ptr.hbm [resolvable:$true] %s29_s20 }
   0x2   :  { %12 = vsyncpa [#allocation4], 0  ;;  %s299_s21 = smov [#allocation5]   ;;  %s18_s25 = sshll.u32 %s353_s0, 4  ;;  %s19_s25 = int_to_ptr.hbm [resolvable:$true] %s18_s25 }
   0x3   :  { %s31_s22 = sshll.u32 %s299_s21, 4  ;;  %s300_s26 = smov [#allocation2]   ;;  %s32_s22 = int_to_ptr.vmem [resolvable:$true] %s31_s22 }
   0x4   :  { %34 = dma.hbm_to_vmem [thread:$0]  %s30_s20, 128, %s32_s22, [#allocation6]  }
   0x5   :  { %s20_s27 = sshll.u32 %s300_s26, 4  ;;  %s41_s30 = sshll.u32 %s356_s3, 4  ;;  %s21_s27 = int_to_ptr.vmem [resolvable:$true] %s20_s27  ;;  %s42_s30 = int_to_ptr.hbm [resolvable:$true] %s41_s30 }
   0x6   :  { %23 = dma.hbm_to_vmem [thread:$0]  %s19_s25, 128, %s21_s27, [#allocation3]  }
   0x7   :  { %s301_s1 = smov [#allocation7]   ;;  %s302_s7 = smov 128  }
   0x8   :  { %s43_s6 = sshll.u32 %s301_s1, 4  ;;  %s303_s8 = smov 8   ;;  %s44_s6 = int_to_ptr.vmem [resolvable:$true] %s43_s6 }
   0x9   :  { %49 = dma.hbm_to_vmem [thread:$0]  %s42_s30, 2048, %s44_s6, [#allocation6], %s302_s7, %s302_s7, %s303_s8  }
   0xa   :  { %293 = dma.done.wait [#allocation3], 128  }
   0xb   :  { %294 = vsyncadd [#allocation3], 4294967168 }
   0xc   :  { %295 = dma.done.wait [#allocation6], 2176  }
   0xd   :  { %296 = vsyncadd [#allocation6], 4294965120  ;;  %vm70_vm0 = vcmask 64512   ;;  %v65_v0 = vld [vmem:[#allocation5] sm:$0xff]  ;;  %v64_v1 = vld [vmem:[#allocation2] sm:$0xff]  ;;  %v135_v22 = vlaneseq  ;;  %s173_s13 = sshll.u32 %s358_s5, 4  ;;  %s174_s13 = int_to_ptr.hbm [resolvable:$true] %s173_s13 }
   0xe   :  { %v110_v2 = vld [vmem:[#allocation7 + $0x78] sm:$0xff]  ;;  %89 = vmatpush.msra.mxu0 %v65_v0  ;;  %v109_v3 = vld [vmem:[#allocation7 + $0x70] sm:$0xff]  ;;  %v108_v4 = vld [vmem:[#allocation7 + $0x68] sm:$0xff] }
   0xf   :  { %115 = vmatpush.msra.mxu1 %v110_v2  ;;  %184 = vmatmul.msk.f32.vlgmr.msra.gmra.mxu0 %vm70_vm0, %v64_v1  ;;  %v107_v5 = vld [vmem:[#allocation7 + $0x60] sm:$0xff]  ;;  %v106_v6 = vld [vmem:[#allocation7 + $0x58] sm:$0xff]  ;;  %v105_v7 = vld [vmem:[#allocation7 + $0x50] sm:$0xff]  ;;  %v136_v23 = vand.u32 127, %v135_v22 }
  0x10   :  { %v104_v8 = vld [vmem:[#allocation7 + $0x48] sm:$0xff]  ;;  %v103_v9 = vld [vmem:[#allocation7 + $0x40] sm:$0xff]  ;;  %v102_v10 = vld [vmem:[#allocation7 + $0x38] sm:$0xff] }
  0x11   :  { %116 = vmatpush.msra.mxu1 %v109_v3  ;;  %v101_v11 = vld [vmem:[#allocation7 + $0x30] sm:$0xff]  ;;  %v100_v12 = vld [vmem:[#allocation7 + $0x28] sm:$0xff]  ;;  %v99_v13 = vld [vmem:[#allocation7 + $0x20] sm:$0xff]  ;;  %vm137_vm1 = vcmp.ge.s32.totalorder %v136_v23, 1  ;;  %vm138_vm2 = vcmp.le.s32.totalorder %v136_v23, 4  ;;  %vm163_vm8 = vcmp.eq.s32.totalorder %v136_v23, 0 }
  0x12   :  { %v98_v14 = vld [vmem:[#allocation7 + $0x18] sm:$0xff]  ;;  %v97_v15 = vld [vmem:[#allocation7 + $0x10] sm:$0xff]  ;;  %v96_v16 = vld [vmem:[#allocation7 + $0x8] sm:$0xff] }
  0x13   :  { %117 = vmatpush.msra.mxu1 %v108_v4  ;;  %v95_v17 = vld [vmem:[#allocation7] sm:$0xff]  ;;  %v191_v18 = vld [vmem:[%s355_s2] ss:$0 sm:$0xff]  ;;  %vm139_vm3 = vmand %vm137_vm1, %vm138_vm2  ;;  %s304_s2 = smov [#allocation8]  }
  0x14   :  { %v192_v24 = vld [vmem:[%s357_s4] ss:$0 sm:$0xff]  ;;  %s171_s4 = sshll.u32 %s304_s2, 4  ;;  %s172_s4 = int_to_ptr.vmem [resolvable:$true] %s171_s4 }
  0x15   :  { %118 = vmatpush.msra.mxu1 %v107_v5 }
  0x17   :  { %119 = vmatpush.msra.mxu1 %v106_v6 }
  0x19   :  { %120 = vmatpush.msra.mxu1 %v105_v7 }
  0x1b   :  { %121 = vmatpush.msra.mxu1 %v104_v8 }
  0x1d   :  { %122 = vmatpush.msra.mxu1 %v103_v9 }
  0x1f   :  { %123 = vmatpush.msra.mxu1 %v102_v10 }
  0x21   :  { %124 = vmatpush.msra.mxu1 %v101_v11 }
  0x23   :  { %125 = vmatpush.msra.mxu1 %v100_v12 }
  0x25   :  { %126 = vmatpush.msra.mxu1 %v99_v13 }
  0x27   :  { %127 = vmatpush.msra.mxu1 %v98_v14 }
  0x29   :  { %128 = vmatpush.msra.mxu1 %v97_v15 }
  0x2b   :  { %129 = vmatpush.msra.mxu1 %v96_v16 }
  0x2d   :  { %130 = vmatpush.msra.mxu1 %v95_v17 }
  0x8c   :  { %v91_v19 = vpop.f32.mrf.mxu0 }
  0x8d   :  { %v92_v20 = vadd.f32 %v191_v18, %v91_v19 }
  0x8f   :  { %v94_v21 = vmax.f32 %v92_v20, 0.0 }
  0x91   :  { %131 = vmatmul.f32.vlgmr.msra.gmra.mxu1 %v94_v21 }
 0x10e   :  { %v132_v25 = vpop.f32.mrf.mxu1 }
 0x10f   :  { %v133_v26 = vadd.f32 %v192_v24, %v132_v25 }
 0x111   :  { %v140_v27 = vsel %vm139_vm3, %v133_v26, -1e+30 }
 0x112   :  { %141 = vmax.xlane.f32.xlu0 %v140_v27 }
 0x185   :  { %v142_v28 = vpop.xlane.xlu0 %141 }
 0x186   :  { %v143_v29 = vsub.f32 %v140_v27, %v142_v28 }
 0x188   :  { %v144_v30 = vmul.f32 1.442695, %v143_v29 }
 0x18a   :  { %193 = vpow2.f32 %v144_v30 }
 0x190   :  { %v194_v31 = vpop.eup %193 }
 0x191   :  { %146 = vadd.xlane.f32.xlu0 %v194_v31 }
 0x204   :  { %v147_v32 = vpop.xlane.xlu0 %146 }
 0x205   :  { %195 = vrcp.f32 %v147_v32  ;;  %v159_v36 = vand.u32 2147483648, %v147_v32  ;;  %v157_v38 = vand.u32 2147483647, %v147_v32  ;;  %vm153_vm5 = vweird.f32 %v147_v32 }
 0x207   :  { %v160_v40 = vor.u32 1.1754944e-38, %v159_v36  ;;  %vm158_vm7 = vcmp.eq.f32.partialorder %v157_v38, 8.507059e+37 }
 0x20b   :  { %v196_v33 = vpop.eup %195 }
 0x20c   :  { %v149_v34 = vmul.f32 %v196_v33, %v147_v32  ;;  %vm154_vm4 = vweird.f32 %v196_v33 }
 0x20d   :  { %vm155_vm6 = vmor %vm153_vm5, %vm154_vm4 }
 0x20e   :  { %v150_v35 = vsub.f32 1.0, %v149_v34 }
 0x210   :  { %v151_v37 = vmul.f32 %v196_v33, %v150_v35 }
 0x212   :  { %v152_v39 = vadd.f32 %v196_v33, %v151_v37 }
 0x214   :  { %v156_v41 = vsel %vm155_vm6, %v196_v33, %v152_v39 }
 0x215   :  { %v161_v42 = vsel %vm158_vm7, %v160_v40, %v156_v41 }
 0x216   :  { %v162_v43 = vmul.f32 %v194_v31, %v161_v42 }
 0x218   :  { %v164_v44 = vsel %vm163_vm8, %v133_v26, %v162_v43 }
 0x219   :  { %165 = vst [vmem:[#allocation8] sm:$0xff] %v164_v44 }
 0x21a   :  { %176 = dma.vmem_to_hbm [thread:$0]  %s172_s4, 128, %s174_s13, [#allocation4]  }
 0x21b   :  { %297 = dma.done.wait [#allocation4], 128  }
 0x21c   :  { %298 = vsyncadd [#allocation4], 4294967168 }
 0x21d   :  { %181 = vsyncpa [#allocation3], 1 }
 0x21e   :  { %182 = vsyncpa [#allocation6], 1 }
 0x21f   :  { %183 = vsyncpa [#allocation4], 1 }

</bundles_post_ra>
